<compile_context>
chip_gen: v7x
topology: tpu7x:2x2x1
jax: 0.10.0
libtpu: 0.0.40
codegen_flags: <defaults>
</compile_context>

<pallas_src>
import jax
import jax.numpy as jnp
from jax.experimental import pallas as pl
from jax.experimental.pallas import tpu as pltpu


def mix_kernel(w_ref, fea1_ref, fea2_ref, out_ref):
    # w_ref is the scalar-prefetch parameter (SMEM, shape (1,)).
    # Scalar sigmoid in f32 for precision, then cast to the feature dtype so
    # bf16/f16 features are processed in their native VPU precision.
    mf = jax.nn.sigmoid(w_ref[0].astype(jnp.float32)).astype(fea1_ref.dtype)
    f2 = fea2_ref[...]
    # lerp form: fea2 + (fea1 - fea2) * mf  ==  fea1*mf + fea2*(1-mf)
    out_ref[...] = (f2 + (fea1_ref[...] - f2) * mf).astype(out_ref.dtype)


_LANE_CANDIDATES = (2048, 1024, 512, 256, 128)


def mix_pallas(fea1, fea2, w, *, block_bytes=2 << 20):
    """out = fea1 * sigmoid(w) + fea2 * (1 - sigmoid(w)), elementwise."""
    assert fea1.shape == fea2.shape, "fea1/fea2 must share a shape"
    dtype = jnp.promote_types(fea1.dtype, fea2.dtype)
    fea1 = fea1.astype(dtype)
    fea2 = fea2.astype(dtype)
    orig_shape = fea1.shape
    total = fea1.size

    w = jnp.asarray(w, jnp.float32).reshape(1)

    # Lane-dense flat 2D view (rows, lane): lane is a large multiple of 128 chosen
    # to divide the element count, so the pad path below almost never triggers.
    lane = next((c for c in _LANE_CANDIDATES if total % c == 0), 128)
    pad = (-total) % lane
    rows = (total + pad) // lane

    x1 = fea1.reshape(-1)
    x2 = fea2.reshape(-1)
    if pad:  # only when total isn't a multiple of 128 (rare, < 128 elements)
        x1 = jnp.pad(x1, (0, pad))
        x2 = jnp.pad(x2, (0, pad))
    x1 = x1.reshape(rows, lane)
    x2 = x2.reshape(rows, lane)

    # Row tile: ~block_bytes per stream per step, multiple of 8 (sublanes).
    itemsize = jnp.dtype(dtype).itemsize
    tr = max(8, (block_bytes // (lane * itemsize)) // 8 * 8)
    if rows <= tr:
        # Small-input fast path: single block equal to the full array dims
        # (satisfies the (8,128) rule even when rows % 8 != 0).
        tr = rows
    grid = (pl.cdiv(rows, tr),)

    out2d = pl.pallas_call(
        mix_kernel,
        out_shape=jax.ShapeDtypeStruct((rows, lane), dtype),
        grid_spec=pltpu.PrefetchScalarGridSpec(
            num_scalar_prefetch=1,               # w lands in SMEM
            grid=grid,
            in_specs=[
                pl.BlockSpec((tr, lane), lambda i, w_s: (i, 0)),
                pl.BlockSpec((tr, lane), lambda i, w_s: (i, 0)),
            ],
            out_specs=pl.BlockSpec((tr, lane), lambda i, w_s: (i, 0)),
        ),
        compiler_params=pltpu.CompilerParams(
            dimension_semantics=("parallel",),
            # ~12 MiB double-buffered VMEM in use; 32 MiB scoped limit is safe on
            # v5e/v6e/v7x and avoids v5e's 16 MiB default being too tight.
            vmem_limit_bytes=32 << 20,
        ),
    )(w, x1, x2)

    out_flat = out2d.reshape(-1)
    if pad:
        out_flat = out_flat[:total]
    return out_flat.reshape(orig_shape)


if __name__ == "__main__":
    key = jax.random.PRNGKey(0)
    k1, k2 = jax.random.split(key)

    # Small NCHW features consistent with the module's elementwise forward.
    fea1 = jax.random.normal(k1, (2, 4, 16, 16), dtype=jnp.float32)
    fea2 = jax.random.normal(k2, (2, 4, 16, 16), dtype=jnp.float32)

    # Deterministic parameter init: m = -0.8 (as in Mix.__init__).
    w = jnp.array([-0.8], dtype=jnp.float32)

    out = mix_pallas(fea1, fea2, w)
    out = jax.block_until_ready(out)

    # Pure-JAX reference check.
    mf = jax.nn.sigmoid(w[0])
    ref = fea1 * mf + fea2 * (1.0 - mf)
    assert out.shape == fea1.shape
    assert jnp.allclose(out, ref, atol=1e-6, rtol=1e-5)

    print("KERNEL_OK")
</pallas_src>

<mosaic_0001>
module attributes {stable_mosaic.version = 11 : i64} {
  func.func @mix_kernel(%arg0: i32, %arg1: memref<1xf32, #tpu.memory_space<smem>>, %arg2: memref<1x2048xf32, #tpu.memory_space<vmem>>, %arg3: memref<1x2048xf32, #tpu.memory_space<vmem>>, %arg4: memref<1x2048xf32, #tpu.memory_space<vmem>>) attributes {dimension_semantics = [#tpu.dimension_semantics<parallel>], iteration_bounds = array<i64: 1>, scalar_prefetch = 1 : i64, scratch_operands = 0 : i64, tpu.core_type = #tpu.core_type<tc>, window_params = [{transform_indices = @transform_0, window_bounds = array<i64: 1, 2048>}, {transform_indices = @transform_1, window_bounds = array<i64: 1, 2048>}, {transform_indices = @transform_2, window_bounds = array<i64: 1, 2048>}]} {
    %c0 = arith.constant 0 : index
    %0 = memref.load %arg1[%c0] : memref<1xf32, #tpu.memory_space<smem>>
    %1 = arith.negf %0 : f32
    %2 = math.exp %1 : f32
    %cst = arith.constant 1.000000e+00 : f32
    %3 = arith.addf %cst, %2 : f32
    %4 = arith.divf %cst, %3 : f32
    %c0_0 = arith.constant 0 : index
    %c0_1 = arith.constant 0 : index
    %5 = vector.load %arg3[%c0_0, %c0_1] : memref<1x2048xf32, #tpu.memory_space<vmem>>, vector<1x2048xf32>
    %c0_2 = arith.constant 0 : index
    %c0_3 = arith.constant 0 : index
    %6 = vector.load %arg2[%c0_2, %c0_3] : memref<1x2048xf32, #tpu.memory_space<vmem>>, vector<1x2048xf32>
    %7 = arith.subf %6, %5 : vector<1x2048xf32>
    %8 = vector.broadcast %4 : f32 to vector<1x2048xf32>
    %9 = arith.mulf %7, %8 : vector<1x2048xf32>
    %10 = arith.addf %5, %9 : vector<1x2048xf32>
    %c0_4 = arith.constant 0 : index
    %c0_5 = arith.constant 0 : index
    %11 = vector.load %arg4[%c0_4, %c0_5] : memref<1x2048xf32, #tpu.memory_space<vmem>>, vector<1x2048xf32>
    tpu.vector_store %arg4[%c0_4, %c0_5], %10 {strides = array<i32>} : memref<1x2048xf32, #tpu.memory_space<vmem>>, vector<1x2048xf32>,
    return
  }
  func.func @transform_0(%arg0: i32, %arg1: memref<1xf32, #tpu.memory_space<smem>>) -> (i32, i32) {
    %c0_i32 = arith.constant 0 : i32
    %c0_i32_0 = arith.constant 0 : i32
    return %arg0, %c0_i32 : i32, i32
  }
  func.func @transform_1(%arg0: i32, %arg1: memref<1xf32, #tpu.memory_space<smem>>) -> (i32, i32) {
    %c0_i32 = arith.constant 0 : i32
    %c0_i32_0 = arith.constant 0 : i32
    return %arg0, %c0_i32 : i32, i32
  }
  func.func @transform_2(%arg0: i32, %arg1: memref<1xf32, #tpu.memory_space<smem>>) -> (i32, i32) {
    %c0_i32 = arith.constant 0 : i32
    %c0_i32_0 = arith.constant 0 : i32
    return %arg0, %c0_i32 : i32, i32
  }
}

</mosaic_0001>

<bundles_post_ra>
// kernel: tpu_custom_call.1
= control target key start
LH: loop header
LB: loop body
LE: loop exit
PB: predicated region body
PF: predicated region fallthrough
CT: control target
= control target key end

     0   :  { %9 = vsyncpa [#allocation5], 0  ;;  %s222_s0 = inlined_call_operand.<no memory space> [shape: f32[1], index: 0, kind: input, shape index: {}]   ;;  %s223_s1 = inlined_call_operand.hbm [shape: f32[1,2048], index: 1, kind: input, shape index: {}]   ;;  %s224_s2 = inlined_call_operand.hbm [shape: f32[1,2048], index: 2, kind: input, shape index: {}]   ;;  %s225_s3 = inlined_call_operand.hbm [shape: f32[1,2048], index: 3, kind: output, shape index: {}]  }
   0x1   :  { %10 = vsyncpa [#allocation8], 0 }
   0x2   :  { %11 = vsyncpa [#allocation6], 0  ;;  %s160_s12 = smov [#allocation4]   ;;  %s161_s14 = smov [#allocation7]  }
   0x3   :  { %s18_s13 = sshll.u32 %s160_s12, 4  ;;  %s28_s15 = sshll.u32 %s161_s14, 4  ;;  %s19_s13 = int_to_ptr.vmem [resolvable:$true] %s18_s13  ;;  %s29_s15 = int_to_ptr.vmem [resolvable:$true] %s28_s15 }
   0x4   :  { %s88_s18 = scalar_lea.hbm %s223_s1, 256 }
   0x5   :  { %p89_p0 = scmp.ne.s32.totalorder %s223_s1, %s88_s18  ;;  %p92_p1 = scmp.lt.u32.totalorder %s88_s18, %s223_s1 }
   0x7   :  { %p94_p2 = pnand %p92_p1, %p89_p0 }
   0x9   :  { %97 = shalt.err (!%p94_p2)
}
   0xa   :  { %s98_s23 = scalar_lea.vmem %s19_s13, 256  ;;  %p103_p4 = scmp.lt.s32.totalorder %s19_s13, %s19_s13 }
   0xb   :  { %p99_p3 = scmp.ne.s32.totalorder %s19_s13, %s98_s23  ;;  %p104_p5 = scmp.lt.s32.totalorder %s98_s23, %s98_s23 }
   0xd   :  { %p105_p6 = por %p104_p5, %p103_p4 }
   0xf   :  { %p106_p7 = pnand %p105_p6, %p99_p3 }
  0x11   :  { %109 = shalt.err (!%p106_p7)
}
  0x12   :  { %21 = dma.hbm_to_vmem [thread:$0]  %s223_s1, 256, %s19_s13, [#allocation5]  }
  0x13   :  { %s110_s28 = scalar_lea.hbm %s224_s2, 256 }
  0x14   :  { %p111_p8 = scmp.ne.s32.totalorder %s224_s2, %s110_s28  ;;  %p114_p9 = scmp.lt.u32.totalorder %s110_s28, %s224_s2 }
  0x16   :  { %p116_p10 = pnand %p114_p9, %p111_p8 }
  0x18   :  { %119 = shalt.err (!%p116_p10)
}
  0x19   :  { %s120_s6 = scalar_lea.vmem %s29_s15, 256  ;;  %p125_p12 = scmp.lt.s32.totalorder %s29_s15, %s29_s15 }
  0x1a   :  { %p121_p11 = scmp.ne.s32.totalorder %s29_s15, %s120_s6  ;;  %p126_p13 = scmp.lt.s32.totalorder %s120_s6, %s120_s6 }
  0x1c   :  { %p127_p0 = por %p126_p13, %p125_p12 }
  0x1e   :  { %p128_p1 = pnand %p127_p0, %p121_p11 }
  0x20   :  { %131 = shalt.err (!%p128_p1)
}
  0x21   :  { %31 = dma.hbm_to_vmem [thread:$0]  %s224_s2, 256, %s29_s15, [#allocation8]  }
  0x22   :  { %154 = dma.done.wait [#allocation5], 256  }
  0x23   :  { %155 = vsyncadd [#allocation5], 4294967040  ;;  %s39_s10 = sxor.u32 2147483648, %s222_s0 }
  0x24   :  { %156 = dma.done.wait [#allocation8], 256  }
  0x25   :  { %157 = vsyncadd [#allocation8], 4294967040  ;;  %v40_v0 = vstv %s39_s10  ;;  %v48_v5 = vld [vmem:[#allocation7] sm:$0xff]  ;;  %v49_v6 = vld [vmem:[#allocation7 + $0x8] sm:$0xff]  ;;  %s162_s2 = smov [#allocation9]  }
  0x26   :  { %v41_v1 = vmul.f32 1.442695, %v40_v0  ;;  %v50_v7 = vld [vmem:[#allocation4] sm:$0xff]  ;;  %v51_v8 = vld [vmem:[#allocation4 + $0x8] sm:$0xff]  ;;  %s67_s13 = sshll.u32 %s162_s2, 4  ;;  %s68_s13 = int_to_ptr.vmem [resolvable:$true] %s67_s13 }
  0x27   :  { %v52_v9 = vsub.f32 %v50_v7, %v48_v5  ;;  %v53_v10 = vsub.f32 %v51_v8, %v49_v6  ;;  %s132_s14 = scalar_lea.vmem %s68_s13, 256  ;;  %p137_p3 = scmp.lt.s32.totalorder %s68_s13, %s68_s13 }
  0x28   :  { %84 = vpow2.f32 %v41_v1  ;;  %p133_p2 = scmp.ne.s32.totalorder %s68_s13, %s132_s14  ;;  %p138_p4 = scmp.lt.s32.totalorder %s132_s14, %s132_s14 }
  0x2a   :  { %p139_p5 = por %p138_p4, %p137_p3 }
  0x2c   :  { %p140_p6 = pnand %p139_p5, %p133_p2 }
  0x32   :  { %v85_v2 = vpop.eup %84 }
  0x33   :  { %77 = vpush %v85_v2 }
  0x64   :  { %s78_s11 = spop %77 }
  0x65   :  { %s44_s12 = sadd.f32 1.0, %s78_s11 }
  0x67   :  { %v45_v3 = vstv %s44_s12 }
  0x68   :  { %86 = vrcp.f32 %v45_v3 }
  0x72   :  { %v87_v4 = vpop.eup %86 }
  0x73   :  { %79 = vpush %v87_v4 }
  0xa4   :  { %s80_s0 = spop %79 }
  0xa5   :  { %v54_v11 = vstv %s80_s0 }
  0xa6   :  { %v55_v12 = vmul.f32 %v54_v11, %v52_v9  ;;  %v56_v13 = vmul.f32 %v54_v11, %v53_v10 }
  0xa8   :  { %v57_v14 = vadd.f32 %v55_v12, %v48_v5  ;;  %v58_v15 = vadd.f32 %v56_v13, %v49_v6 }
  0xaa   :  { %59 = vst [vmem:[#allocation9] sm:$0xff] %v57_v14  ;;  %60 = vst [vmem:[#allocation9 + $0x8] sm:$0xff] %v58_v15 }
  0xab   :  { %143 = shalt.err (!%p140_p6)
}
  0xac   :  { %s144_s17 = scalar_lea.hbm %s225_s3, 256 }
  0xad   :  { %p145_p7 = scmp.ne.s32.totalorder %s225_s3, %s144_s17  ;;  %p148_p8 = scmp.lt.u32.totalorder %s144_s17, %s225_s3 }
  0xaf   :  { %p150_p9 = pnand %p148_p8, %p145_p7 }
  0xb1   :  { %153 = shalt.err (!%p150_p9)
}
  0xb2   :  { %70 = dma.vmem_to_hbm [thread:$0]  %s68_s13, 256, %s225_s3, [#allocation6]  }
  0xb3   :  { %158 = dma.done.wait [#allocation6], 256  }
  0xb4   :  { %159 = vsyncadd [#allocation6], 4294967040 }
  0xb5   :  { %74 = vsyncpa [#allocation5], 1 }
  0xb6   :  { %75 = vsyncpa [#allocation8], 1 }
  0xb7   :  { %76 = vsyncpa [#allocation6], 1 }

</bundles_post_ra>
